<compile_context>
chip_gen: v7x
topology: tpu7x:2x2x1
jax: 0.10.0
libtpu: 0.0.40
codegen_flags: <defaults>
</compile_context>

<pallas_src>
import math

import jax
import jax.numpy as jnp
from jax.experimental import pallas as pl
from jax.experimental.pallas import tpu as pltpu

_LANE = 128
_SUBLANE = 8


def make_positional_encoding_table(d_model, max_len=5000, dtype=jnp.float32):
    """Sinusoidal `pe` buffer, identical to PositionalEncoding.__init__ (plain JAX)."""
    position = jnp.arange(0, max_len, dtype=jnp.float32)[:, None]          # (max_len, 1)
    div_term = jnp.exp(
        jnp.arange(0, d_model, 2, dtype=jnp.float32) * (-math.log(10000.0) / d_model)
    )                                                                       # (d_model//2,)
    pe = jnp.zeros((max_len, d_model), dtype=jnp.float32)
    pe = pe.at[:, 0::2].set(jnp.sin(position * div_term))
    pe = pe.at[:, 1::2].set(jnp.cos(position * div_term))
    return pe.astype(dtype)


def _pe_add_kernel(x_ref, pe_ref, o_ref):
    # (TB, TC) + (1, TC) broadcast add, in the input dtype (no f32 round trip).
    o_ref[...] = x_ref[...] + pe_ref[...]


def _pe_add_dropout_kernel(x_ref, pe_ref, m_ref, o_ref):
    # m_ref holds 0 or 1/(1-p) (inverted dropout), already in the compute dtype.
    o_ref[...] = (x_ref[...] + pe_ref[...]) * m_ref[...]


def _pick_col_tile(cols, row_tile, itemsize, budget_bytes=2 * 1024 * 1024):
    """Largest multiple of 128 dividing `cols` with row_tile*tile*itemsize <= budget."""
    if cols % _LANE != 0:
        return cols                      # fall back to full extent (still correct)
    groups = cols // _LANE
    max_groups = max(1, budget_bytes // (row_tile * _LANE * itemsize))
    for k in range(min(groups, max_groups), 0, -1):
        if groups % k == 0:
            return k * _LANE
    return _LANE


def positional_encoding_forward(x, pe, *, p=0.1, training=False, rng_key=None):
    """x: (B, S, D);  pe: (max_len, D).  Returns dropout(x + pe[:S])."""
    B, S, D = x.shape
    dtype = x.dtype
    itemsize = jnp.dtype(dtype).itemsize

    # Lane-dense 2D view: rows = batch, cols = S*D (pe broadcasts across rows).
    cols = S * D
    x2 = x.reshape(B, cols)
    pe2 = pe[:S, :].astype(dtype).reshape(1, cols)

    tb = _SUBLANE if (B % _SUBLANE == 0) else B       # sublane-aligned or full extent
    tc = _pick_col_tile(cols, tb, itemsize)           # multiple of 128 (or full extent)
    n_col = pl.cdiv(cols, tc)
    n_row = pl.cdiv(B, tb)

    x_spec = pl.BlockSpec((tb, tc), lambda c, r: (r, c))
    pe_spec = pl.BlockSpec((1, tc), lambda c, r: (0, c))   # constant over inner r -> resident
    out_spec = pl.BlockSpec((tb, tc), lambda c, r: (r, c))

    use_dropout = bool(training) and float(p) > 0.0
    if use_dropout:
        # TODO(synk): PyTorch's dropout RNG stream cannot be reproduced bit-exactly;
        # the mask is drawn with jax.random here (pltpu.prng_* has no CPU/interpret
        # lowering, which caused the previous failure).
        if rng_key is None:
            rng_key = jax.random.PRNGKey(0)
        keep = jax.random.bernoulli(rng_key, 1.0 - float(p), shape=(B, cols))
        mask2 = keep.astype(dtype) * jnp.asarray(1.0 / (1.0 - float(p)), dtype)
        kernel = _pe_add_dropout_kernel
        in_specs = [x_spec, pe_spec, pl.BlockSpec((tb, tc), lambda c, r: (r, c))]
        operands = (x2, pe2, mask2)
    else:
        kernel = _pe_add_kernel
        in_specs = [x_spec, pe_spec]
        operands = (x2, pe2)

    out2 = pl.pallas_call(
        kernel,
        out_shape=jax.ShapeDtypeStruct((B, cols), dtype),
        grid_spec=pltpu.PrefetchScalarGridSpec(
            num_scalar_prefetch=0,
            grid=(n_col, n_row),
            in_specs=in_specs,
            out_specs=out_spec,
        ),
        compiler_params=pltpu.CompilerParams(
            dimension_semantics=("parallel", "parallel"),
            vmem_limit_bytes=48 * 1024 * 1024,
        ),
    )(*operands)

    return out2.reshape(B, S, D)


if __name__ == "__main__":
    # Small shapes consistent with the module: batch=2, seq=8, d_model=128.
    B, S, D = 2, 8, 128
    key = jax.random.PRNGKey(0)
    x = jax.random.normal(key, (B, S, D), dtype=jnp.float32)

    pe = make_positional_encoding_table(d_model=D, max_len=5000)

    # Eval-mode forward (dropout is identity) — check vs pure-JAX reference.
    out = positional_encoding_forward(x, pe, p=0.1, training=False)
    out = jax.block_until_ready(out)
    ref = x + pe[None, :S, :]
    assert out.shape == (B, S, D)
    assert jnp.allclose(out, ref, atol=1e-6, rtol=1e-6)

    # Training-mode forward (inverted dropout via jax.random mask): kept entries
    # must equal ref / (1 - p); dropped entries are exactly zero.
    p = 0.1
    out_tr = positional_encoding_forward(
        x, pe, p=p, training=True, rng_key=jax.random.PRNGKey(1234)
    )
    out_tr = jax.block_until_ready(out_tr)
    kept = out_tr != 0.0
    assert jnp.allclose(
        jnp.where(kept, out_tr, 0.0),
        jnp.where(kept, ref / (1.0 - p), 0.0),
        atol=1e-5, rtol=1e-5,
    )

    print("KERNEL_OK")
</pallas_src>

<mosaic_0001>
module attributes {stable_mosaic.version = 11 : i64} {
  func.func @_pe_add_kernel(%arg0: i32, %arg1: i32, %arg2: memref<2x1024xf32, #tpu.memory_space<vmem>>, %arg3: memref<1x1024xf32, #tpu.memory_space<vmem>>, %arg4: memref<2x1024xf32, #tpu.memory_space<vmem>>) attributes {dimension_semantics = [#tpu.dimension_semantics<parallel>, #tpu.dimension_semantics<parallel>], iteration_bounds = array<i64: 1, 1>, scalar_prefetch = 0 : i64, scratch_operands = 0 : i64, tpu.core_type = #tpu.core_type<tc>, window_params = [{transform_indices = @transform_0, window_bounds = array<i64: 2, 1024>}, {transform_indices = @transform_1, window_bounds = array<i64: 1, 1024>}, {transform_indices = @transform_2, window_bounds = array<i64: 2, 1024>}]} {
    %c0 = arith.constant 0 : index
    %c0_0 = arith.constant 0 : index
    %0 = vector.load %arg2[%c0, %c0_0] : memref<2x1024xf32, #tpu.memory_space<vmem>>, vector<2x1024xf32>
    %c0_1 = arith.constant 0 : index
    %c0_2 = arith.constant 0 : index
    %1 = vector.load %arg3[%c0_1, %c0_2] : memref<1x1024xf32, #tpu.memory_space<vmem>>, vector<1x1024xf32>
    %2 = vector.broadcast %1 : vector<1x1024xf32> to vector<2x1024xf32>
    %3 = arith.addf %0, %2 : vector<2x1024xf32>
    %c0_3 = arith.constant 0 : index
    %c0_4 = arith.constant 0 : index
    %4 = vector.load %arg4[%c0_3, %c0_4] : memref<2x1024xf32, #tpu.memory_space<vmem>>, vector<2x1024xf32>
    tpu.vector_store %arg4[%c0_3, %c0_4], %3 {strides = array<i32>} : memref<2x1024xf32, #tpu.memory_space<vmem>>, vector<2x1024xf32>,
    return
  }
  func.func @transform_0(%arg0: i32, %arg1: i32) -> (i32, i32) {
    %c0_i32 = arith.constant 0 : i32
    return %arg1, %arg0 : i32, i32
  }
  func.func @transform_1(%arg0: i32, %arg1: i32) -> (i32, i32) {
    %c0_i32 = arith.constant 0 : i32
    %c0_i32_0 = arith.constant 0 : i32
    return %c0_i32, %arg0 : i32, i32
  }
  func.func @transform_2(%arg0: i32, %arg1: i32) -> (i32, i32) {
    %c0_i32 = arith.constant 0 : i32
    return %arg1, %arg0 : i32, i32
  }
}

</mosaic_0001>

<bundles_post_ra>
// kernel: tpu_custom_call.1
= control target key start
LH: loop header
LB: loop body
LE: loop exit
PB: predicated region body
PF: predicated region fallthrough
CT: control target
= control target key end

     0   :  { %7 = vsyncpa [#allocation3], 0  ;;  %s259_s0 = inlined_call_operand.hbm [shape: f32[2,1024], index: 0, kind: input, shape index: {}]   ;;  %s260_s1 = inlined_call_operand.hbm [shape: f32[1,1024], index: 1, kind: input, shape index: {}]   ;;  %s261_s2 = inlined_call_operand.hbm [shape: f32[2,1024], index: 2, kind: output, shape index: {}]  }
   0x1   :  { %8 = vsyncpa [#allocation6], 0 }
   0x2   :  { %9 = vsyncpa [#allocation4], 0  ;;  %s204_s9 = smov [#allocation2]   ;;  %s205_s11 = smov [#allocation5]  }
   0x3   :  { %s16_s10 = sshll.u32 %s204_s9, 4  ;;  %s26_s12 = sshll.u32 %s205_s11, 4  ;;  %s17_s10 = int_to_ptr.vmem [resolvable:$true] %s16_s10  ;;  %s27_s12 = int_to_ptr.vmem [resolvable:$true] %s26_s12 }
   0x4   :  { %s132_s15 = scalar_lea.hbm %s259_s0, 256 }
   0x5   :  { %p133_p0 = scmp.ne.s32.totalorder %s259_s0, %s132_s15  ;;  %p136_p1 = scmp.lt.u32.totalorder %s132_s15, %s259_s0 }
   0x7   :  { %p138_p2 = pnand %p136_p1, %p133_p0 }
   0x9   :  { %141 = shalt.err (!%p138_p2)
}
   0xa   :  { %s142_s20 = scalar_lea.vmem %s17_s10, 256  ;;  %p147_p4 = scmp.lt.s32.totalorder %s17_s10, %s17_s10 }
   0xb   :  { %p143_p3 = scmp.ne.s32.totalorder %s17_s10, %s142_s20  ;;  %p148_p5 = scmp.lt.s32.totalorder %s142_s20, %s142_s20 }
   0xd   :  { %p149_p6 = por %p148_p5, %p147_p4 }
   0xf   :  { %p150_p7 = pnand %p149_p6, %p143_p3 }
  0x11   :  { %153 = shalt.err (!%p150_p7)
}
  0x12   :  { %19 = dma.hbm_to_vmem [thread:$0]  %s259_s0, 256, %s17_s10, [#allocation3]  }
  0x13   :  { %s154_s25 = scalar_lea.hbm %s260_s1, 128 }
  0x14   :  { %p155_p8 = scmp.ne.s32.totalorder %s260_s1, %s154_s25  ;;  %p158_p9 = scmp.lt.u32.totalorder %s154_s25, %s260_s1 }
  0x16   :  { %p160_p10 = pnand %p158_p9, %p155_p8 }
  0x18   :  { %163 = shalt.err (!%p160_p10)
}
  0x19   :  { %s164_s30 = scalar_lea.vmem %s27_s12, 128  ;;  %p169_p12 = scmp.lt.s32.totalorder %s27_s12, %s27_s12 }
  0x1a   :  { %p165_p11 = scmp.ne.s32.totalorder %s27_s12, %s164_s30  ;;  %p170_p13 = scmp.lt.s32.totalorder %s164_s30, %s164_s30 }
  0x1c   :  { %p171_p0 = por %p170_p13, %p169_p12 }
  0x1e   :  { %p172_p1 = pnand %p171_p0, %p165_p11 }
  0x20   :  { %175 = shalt.err (!%p172_p1)
}
  0x21   :  { %29 = dma.hbm_to_vmem [thread:$0]  %s260_s1, 128, %s27_s12, [#allocation6]  }
  0x22   :  { %198 = dma.done.wait [#allocation3], 256  }
  0x23   :  { %199 = vsyncadd [#allocation3], 4294967040 }
  0x24   :  { %200 = dma.done.wait [#allocation6], 128  }
  0x25   :  { %201 = vsyncadd [#allocation6], 4294967168  ;;  %v40_v0 = vlaneseq  ;;  %v206_v1 = vmov 1983009808   ;;  %v38_v13 = vld [vmem:[#allocation5] sm:$0xff]  ;;  %v36_v29 = vld [vmem:[#allocation2] sm:$0xff] }
  0x26   :  { %v75_v2 = vunpack.c.l.s4 %v206_v1  ;;  %v37_v33 = vld [vmem:[#allocation2 + $0x8] sm:$0xff]  ;;  %s207_s1 = smov [#allocation7]  }
  0x27   :  { %v41_v3 = vshrl.u32 %v40_v0, 7  ;;  %s118_s4 = sshll.u32 %s207_s1, 4  ;;  %s119_s4 = int_to_ptr.vmem [resolvable:$true] %s118_s4 }
  0x28   :  { %v76_v4 = vunpack.c.0.s8 %v75_v2  ;;  %s176_s5 = scalar_lea.vmem %s119_s4, 256  ;;  %p181_p3 = scmp.lt.s32.totalorder %s119_s4, %s119_s4 }
  0x29   :  { %v42_v5 = vsub.s32 0, %v41_v3  ;;  %v46_v6 = vsub.s32 1, %v41_v3  ;;  %v50_v7 = vsub.s32 2, %v41_v3  ;;  %v54_v8 = vsub.s32 3, %v41_v3  ;;  %p177_p2 = scmp.ne.s32.totalorder %s119_s4, %s176_s5  ;;  %p182_p4 = scmp.lt.s32.totalorder %s176_s5, %s176_s5 }
  0x2a   :  { %v58_v9 = vsub.s32 4, %v41_v3  ;;  %v62_v10 = vsub.s32 5, %v41_v3  ;;  %v66_v11 = vsub.s32 6, %v41_v3  ;;  %v70_v12 = vsub.s32 7, %v41_v3 }
  0x2b   :  { %v79_v14 = vsub.s32 %v76_v4, %v41_v3  ;;  %v43_v15 = vrot.slane %v38_v13, %v42_v5  ;;  %v47_v16 = vrot.slane %v38_v13, %v46_v6  ;;  %v51_v17 = vrot.slane %v38_v13, %v50_v7  ;;  %p183_p5 = por %p182_p4, %p181_p3 }
  0x2c   :  { %v55_v18 = vrot.slane %v38_v13, %v54_v8  ;;  %v59_v19 = vrot.slane %v38_v13, %v58_v9  ;;  %v63_v20 = vrot.slane %v38_v13, %v62_v10  ;;  %v67_v21 = vrot.slane %v38_v13, %v66_v11 }
  0x2d   :  { %v71_v22 = vrot.slane %v38_v13, %v70_v12  ;;  %v72_v23 = vcombine.low %v43_v15, %v47_v16  ;;  %p184_p6 = pnand %p183_p5, %p177_p2 }
  0x2e   :  { %v73_v24 = vcombine.low %v51_v17, %v55_v18  ;;  %v89_v25 = vcombine.low %v59_v19, %v63_v20 }
  0x2f   :  { %v90_v26 = vcombine.low %v67_v21, %v71_v22  ;;  %v80_v27 = vrot.slane %v72_v23, %v79_v14 }
  0x30   :  { %v87_v28 = vrot.slane %v73_v24, %v79_v14  ;;  %v97_v30 = vrot.slane %v89_v25, %v79_v14 }
  0x31   :  { %v104_v31 = vrot.slane %v90_v26, %v79_v14 }
  0x32   :  { %v88_v32 = vcombine.low %v80_v27, %v87_v28 }
  0x33   :  { %v105_v34 = vcombine.low %v97_v30, %v104_v31 }
  0x34   :  { %v108_v35 = vadd.f32 %v88_v32, %v36_v29 }
  0x35   :  { %v109_v36 = vadd.f32 %v105_v34, %v37_v33 }
  0x36   :  { %110 = vst [vmem:[#allocation7] sm:$0xff] %v108_v35 }
  0x37   :  { %111 = vst [vmem:[#allocation7 + $0x8] sm:$0xff] %v109_v36 }
  0x38   :  { %187 = shalt.err (!%p184_p6)
}
  0x39   :  { %s188_s8 = scalar_lea.hbm %s261_s2, 256 }
  0x3a   :  { %p189_p7 = scmp.ne.s32.totalorder %s261_s2, %s188_s8  ;;  %p192_p8 = scmp.lt.u32.totalorder %s188_s8, %s261_s2 }
  0x3c   :  { %p194_p9 = pnand %p192_p8, %p189_p7 }
  0x3e   :  { %197 = shalt.err (!%p194_p9)
}
  0x3f   :  { %121 = dma.vmem_to_hbm [thread:$0]  %s119_s4, 256, %s261_s2, [#allocation4]  }
  0x40   :  { %202 = dma.done.wait [#allocation4], 256  }
  0x41   :  { %203 = vsyncadd [#allocation4], 4294967040 }
  0x42   :  { %125 = vsyncpa [#allocation3], 1 }
  0x43   :  { %126 = vsyncpa [#allocation6], 1 }
  0x44   :  { %127 = vsyncpa [#allocation4], 1 }

</bundles_post_ra>
